<compile_context>
chip_gen: v6e
topology: v6e:2x2x1
jax: 0.10.0
libtpu: 0.0.40
codegen_flags: <defaults>
</compile_context>

<pallas_src>
import functools

import jax
import jax.numpy as jnp
from jax.experimental import pallas as pl
from jax.experimental.pallas import tpu as pltpu


def _round_up(x, m):
    return ((x + m - 1) // m) * m


def _linear_neck_kernel(x_ref, w_ref, b_ref, o_ref, *, inv_hw):
    # x_ref: (TILE_N, C, HW)   w_ref: (C, OUT_P)   b_ref: (1, OUT_P)
    # o_ref: (TILE_N, OUT_P)
    # Spatial average pool: lane-axis (XLU) reduction with an f32 accumulator;
    # the 1/(H*W) scale is folded into one multiply on the small pooled tensor.
    pooled = jnp.sum(x_ref[...], axis=-1, dtype=jnp.float32) * inv_hw   # (TILE_N, C)
    y = jnp.dot(pooled, w_ref[...].astype(jnp.float32),
                preferred_element_type=jnp.float32)                     # (TILE_N, OUT_P)
    y = y + b_ref[...].astype(jnp.float32)
    o_ref[...] = y.astype(o_ref.dtype)


def linear_neck(x_nchw, weight_out_in, bias, with_avg_pool=True):
    """Forward pass of LinearNeck: [fc(avgpool(x).view(N, -1))].

    Args:
      x_nchw: (N, C, H, W) input (single-element tuple in the PyTorch module).
      weight_out_in: (out_channels, in_channels) — PyTorch nn.Linear layout.
      bias: (out_channels,)
      with_avg_pool: matches the module flag.
    """
    if not with_avg_pool:
        # TODO(synk): with_avg_pool=False path (fc over flattened C*H*W) not implemented in-kernel.
        raise NotImplementedError("with_avg_pool=False not implemented")

    N, C, H, W = x_nchw.shape
    HW = H * W
    OUT = weight_out_in.shape[0]
    dtype = x_nchw.dtype
    itemsize = jnp.dtype(dtype).itemsize
    sub = max(8, 32 // itemsize)          # sublane multiple: 8 (f32), 16 (bf16), 32 (i8/fp8)

    # ---- lane-dense fc output: pad OUT to a multiple of 128, slice afterwards.
    OUT_P = _round_up(OUT, 128)
    w = jnp.transpose(weight_out_in)                      # (C, OUT)
    if OUT_P != OUT:
        w = jnp.pad(w, ((0, 0), (0, OUT_P - OUT)))
        b = jnp.pad(bias, (0, OUT_P - OUT))
    else:
        b = bias
    b = b.reshape(1, OUT_P)

    # ---- per-generation tile sizing (v7x: 64 MiB VMEM, v5e/v6e: 128 MiB).
    try:
        vmem_cap = int(pltpu.get_tpu_info().vmem_capacity_bytes)
    except Exception:
        vmem_cap = 64 << 20
    x_buf_budget = (10 << 20) if vmem_cap <= (64 << 20) else (14 << 20)

    # Padded VMEM bytes of one sample's (C, HW) slab (sublane/lane tiling).
    per_sample = _round_up(C, sub) * _round_up(HW, 128) * itemsize
    tile_n = max(1, x_buf_budget // per_sample)
    if tile_n >= N:
        tile_n = N
        n_pad = N
    else:
        tile_n = max(sub, (tile_n // sub) * sub)          # keep output sublanes dense
        n_pad = _round_up(N, tile_n)

    if n_pad != N:
        x_nchw = jnp.pad(x_nchw, ((0, n_pad - N), (0, 0), (0, 0), (0, 0)))
    x3 = x_nchw.reshape(n_pad, C, HW)

    w_itemsize = jnp.dtype(w.dtype).itemsize
    needed = (2 * tile_n * per_sample                                   # double-buffered x tiles
              + 2 * _round_up(C, 8) * OUT_P * w_itemsize                # resident fc weight
              + 2 * _round_up(tile_n, 8) * OUT_P * itemsize             # output blocks
              + (2 << 20))                                              # slack
    vmem_limit = int(min(max(needed, 32 << 20), max(vmem_cap - (16 << 20), 32 << 20)))

    kernel = functools.partial(_linear_neck_kernel, inv_hw=float(1.0 / HW))

    out_padded = pl.pallas_call(
        kernel,
        out_shape=jax.ShapeDtypeStruct((n_pad, OUT_P), dtype),
        grid=(n_pad // tile_n,),
        in_specs=[
            pl.BlockSpec((tile_n, C, HW), lambda i: (i, 0, 0)),   # streamed activations
            pl.BlockSpec((C, OUT_P), lambda i: (0, 0)),           # resident fc weight
            pl.BlockSpec((1, OUT_P), lambda i: (0, 0)),           # resident fc bias
        ],
        out_specs=pl.BlockSpec((tile_n, OUT_P), lambda i: (i, 0)),
        compiler_params=pltpu.CompilerParams(
            dimension_semantics=("parallel",),
            vmem_limit_bytes=vmem_limit,
        ),
    )(x3, w, b)

    return [out_padded[:N, :OUT]]


if __name__ == "__main__":
    key = jax.random.PRNGKey(0)
    k_x, k_w = jax.random.split(key)

    # Small shapes consistent with the module: batch=2, in_channels=4,
    # spatial=16x16, out_channels=32.
    N, C, H, W = 2, 4, 16, 16
    OUT = 32

    x = jax.random.normal(k_x, (N, C, H, W), dtype=jnp.float32)

    # Deterministic parameter init mirroring init_weights(init_linear='normal'):
    # weight ~ Normal(0, 0.01), bias = 0.
    weight = 0.01 * jax.random.normal(k_w, (OUT, C), dtype=jnp.float32)
    bias = jnp.zeros((OUT,), dtype=jnp.float32)

    (y,) = linear_neck(x, weight, bias, with_avg_pool=True)
    y = jax.block_until_ready(y)

    # Reference check in plain JAX.
    pooled_ref = jnp.mean(x, axis=(2, 3))
    y_ref = pooled_ref @ weight.T + bias
    assert y.shape == (N, OUT)
    assert jnp.allclose(y, y_ref, atol=1e-5, rtol=1e-5)

    print("KERNEL_OK")
</pallas_src>

<mosaic_0001>
module attributes {stable_mosaic.version = 11 : i64} {
  func.func @_linear_neck_kernel(%arg0: i32, %arg1: memref<2x4x256xf32, #tpu.memory_space<vmem>>, %arg2: memref<4x128xf32, #tpu.memory_space<vmem>>, %arg3: memref<1x128xf32, #tpu.memory_space<vmem>>, %arg4: memref<2x128xf32, #tpu.memory_space<vmem>>) attributes {dimension_semantics = [#tpu.dimension_semantics<parallel>], iteration_bounds = array<i64: 1>, scalar_prefetch = 0 : i64, scratch_operands = 0 : i64, tpu.core_type = #tpu.core_type<tc>, window_params = [{transform_indices = @transform_0, window_bounds = array<i64: 2, 4, 256>}, {pipeline_mode = #tpu.pipeline_mode<synchronous>, transform_indices = @transform_1, window_bounds = array<i64: 4, 128>}, {pipeline_mode = #tpu.pipeline_mode<synchronous>, transform_indices = @transform_2, window_bounds = array<i64: 1, 128>}, {transform_indices = @transform_3, window_bounds = array<i64: 2, 128>}]} {
    %c0 = arith.constant 0 : index
    %c0_0 = arith.constant 0 : index
    %c0_1 = arith.constant 0 : index
    %0 = vector.load %arg1[%c0, %c0_0, %c0_1] : memref<2x4x256xf32, #tpu.memory_space<vmem>>, vector<2x4x256xf32>
    %cst = arith.constant dense<0.000000e+00> : vector<2x4xf32>
    %1 = vector.multi_reduction <add>, %0, %cst [2] : vector<2x4x256xf32> to vector<2x4xf32>
    %cst_2 = arith.constant 3.906250e-03 : f32
    %2 = vector.broadcast %cst_2 : f32 to vector<2x4xf32>
    %3 = arith.mulf %1, %2 : vector<2x4xf32>
    %c0_3 = arith.constant 0 : index
    %c0_4 = arith.constant 0 : index
    %4 = vector.load %arg2[%c0_3, %c0_4] : memref<4x128xf32, #tpu.memory_space<vmem>>, vector<4x128xf32>
    %cst_5 = arith.constant dense<0.000000e+00> : vector<2x128xf32>
    %5 = tpu.matmul %3, %4, %cst_5 {dimension_numbers = #tpu.dot_dimension_numbers<[1], [0], [0], [1], [0, 0, 1, 1], [], []>} : vector<2x4xf32>, vector<4x128xf32>, vector<2x128xf32> -> vector<2x128xf32>
    %c0_6 = arith.constant 0 : index
    %c0_7 = arith.constant 0 : index
    %6 = vector.load %arg3[%c0_6, %c0_7] : memref<1x128xf32, #tpu.memory_space<vmem>>, vector<1x128xf32>
    %7 = vector.broadcast %6 : vector<1x128xf32> to vector<2x128xf32>
    %8 = arith.addf %5, %7 : vector<2x128xf32>
    %c0_8 = arith.constant 0 : index
    %c0_9 = arith.constant 0 : index
    %9 = vector.load %arg4[%c0_8, %c0_9] : memref<2x128xf32, #tpu.memory_space<vmem>>, vector<2x128xf32>
    tpu.vector_store %arg4[%c0_8, %c0_9], %8 {strides = array<i32>} : memref<2x128xf32, #tpu.memory_space<vmem>>, vector<2x128xf32>,
    return
  }
  func.func @transform_0(%arg0: i32) -> (i32, i32, i32) {
    %c0_i32 = arith.constant 0 : i32
    %c0_i32_0 = arith.constant 0 : i32
    %c0_i32_1 = arith.constant 0 : i32
    return %arg0, %c0_i32, %c0_i32_0 : i32, i32, i32
  }
  func.func @transform_1(%arg0: i32) -> (i32, i32) {
    %c0_i32 = arith.constant 0 : i32
    %c0_i32_0 = arith.constant 0 : i32
    %c0_i32_1 = arith.constant 0 : i32
    return %c0_i32, %c0_i32_0 : i32, i32
  }
  func.func @transform_2(%arg0: i32) -> (i32, i32) {
    %c0_i32 = arith.constant 0 : i32
    %c0_i32_0 = arith.constant 0 : i32
    %c0_i32_1 = arith.constant 0 : i32
    return %c0_i32, %c0_i32_0 : i32, i32
  }
  func.func @transform_3(%arg0: i32) -> (i32, i32) {
    %c0_i32 = arith.constant 0 : i32
    %c0_i32_0 = arith.constant 0 : i32
    return %arg0, %c0_i32 : i32, i32
  }
}

</mosaic_0001>

<bundles_post_ra>
// kernel: tpu_custom_call.1
= control target key start
LH: loop header
LB: loop body
LE: loop exit
PB: predicated region body
PF: predicated region fallthrough
CT: control target
= control target key end

     0   :  { %8 = vsyncpa [#allocation3], 0  ;;  %s306_s0 = inlined_call_operand.hbm [shape: f32[2,4,256], index: 0, kind: input, shape index: {}]   ;;  %s307_s1 = inlined_call_operand.hbm [shape: f32[4,128], index: 1, kind: input, shape index: {}]   ;;  %s308_s2 = inlined_call_operand.vmem [shape: f32[1,128], index: 2, kind: input, shape index: {}]   ;;  %s309_s3 = inlined_call_operand.hbm [shape: f32[2,128], index: 3, kind: output, shape index: {}]  }
   0x1   :  { %9 = vsyncpa [#allocation6], 0 }
   0x2   :  { %10 = vsyncpa [#allocation4], 0  ;;  %s262_s12 = smov [#allocation2]  }
   0x3   :  { %s16_s13 = sshll.u32 %s262_s12, 4  ;;  %s17_s13 = int_to_ptr.vmem [resolvable:$true] %s16_s13 }
   0x4   :  { %s204_s14 = scalar_lea.vmem %s17_s13, 256  ;;  %p209_p1 = scmp.lt.s32.totalorder %s17_s13, %s17_s13 }
   0x5   :  { %p205_p0 = scmp.ne.s32.totalorder %s17_s13, %s204_s14  ;;  %p210_p2 = scmp.lt.s32.totalorder %s204_s14, %s204_s14 }
   0x7   :  { %p211_p3 = por %p210_p2, %p209_p1 }
   0x9   :  { %p212_p4 = pnand %p211_p3, %p205_p0 }
   0xb   :  { %215 = shalt.err (!%p212_p4)
}
   0xc   :  { %s263_s15 = smov 128   ;;  %s264_s16 = smov 8  }
   0xd   :  { %22 = dma.hbm_to_vmem [thread:$0]  %s306_s0, 256, %s17_s13, [#allocation3], %s263_s15, %s263_s15, %s264_s16  }
   0xe   :  { %s265_s19 = smov [#allocation5]  }
   0xf   :  { %s29_s20 = sshll.u32 %s265_s19, 4  ;;  %s30_s20 = int_to_ptr.vmem [resolvable:$true] %s29_s20 }
  0x10   :  { %s224_s21 = scalar_lea.vmem %s30_s20, 64  ;;  %p229_p6 = scmp.lt.s32.totalorder %s30_s20, %s30_s20 }
  0x11   :  { %p225_p5 = scmp.ne.s32.totalorder %s30_s20, %s224_s21  ;;  %p230_p7 = scmp.lt.s32.totalorder %s224_s21, %s224_s21 }
  0x13   :  { %p231_p8 = por %p230_p7, %p229_p6 }
  0x15   :  { %p232_p9 = pnand %p231_p8, %p225_p5 }
  0x17   :  { %235 = shalt.err (!%p232_p9)
}
  0x18   :  { %32 = dma.hbm_to_vmem [thread:$0]  %s307_s1, 64, %s30_s20, [#allocation6]  }
  0x19   :  { %256 = dma.done.wait [#allocation3], 256  }
  0x1a   :  { %257 = vsyncadd [#allocation3], 4294967040 }
  0x1b   :  { %258 = dma.done.wait [#allocation6], 64  }
  0x1c   :  { %259 = vsyncadd [#allocation6], 4294967232  ;;  %vm49_vm0 = vcmask 1043456   ;;  %v41_v0 = vld [vmem:[#allocation2] sm:$0xff]  ;;  %v42_v1 = vld [vmem:[#allocation2 + $0x8] sm:$0xff]  ;;  %v266_v11 = vmov 0.0   ;;  %v72_v12 = vlaneseq }
  0x1d   :  { %v45_v2 = vcombine.high %v41_v0, %v41_v0  ;;  %v50_v3 = vsel %vm49_vm0, %v41_v0, 0.0  ;;  %v46_v4 = vcombine.high %v42_v1, %v42_v1  ;;  %v55_v6 = vsel %vm49_vm0, %v42_v1, 0.0  ;;  %v62_v10 = vld [vmem:[#allocation5] sm:$0xf]  ;;  %182 = vmatprep.subr.mxu0 %v266_v11  ;;  %v177_v23 = vld [vmem:[%s308_s2] ss:$0 sm:$0xff] }
  0x1e   :  { %vm267_vm1 = vmmov 0   ;;  %183 = vmatpush3.msk.msra.mxu0 %vm49_vm0, %v62_v10  ;;  %v73_v13 = vand.u32 127, %v72_v12  ;;  %v75_v14 = vshrl.u32 %v72_v12, 7  ;;  %vm82_vm2 = vcmask 1041409   ;;  %s268_s24 = smov [#allocation7]  }
  0x1f   :  { %v51_v5 = vsel %vm49_vm0, %v45_v2, 0.0  ;;  %v56_v7 = vsel %vm49_vm0, %v46_v4, 0.0  ;;  %184 = vmatprep.mubr.msk.f32.mxu0 %vm267_vm1, %v266_v11  ;;  %vm84_vm3 = vcmask 31744   ;;  %s167_s25 = sshll.u32 %s268_s24, 4  ;;  %s168_s25 = int_to_ptr.vmem [resolvable:$true] %s167_s25 }
  0x20   :  { %v52_v8 = vadd.f32 %v51_v5, %v50_v3  ;;  %v57_v9 = vadd.f32 %v56_v7, %v55_v6  ;;  %v76_v16 = vsub.s32 %v73_v13, %v75_v14  ;;  %s236_s26 = scalar_lea.vmem %s168_s25, 32  ;;  %p241_p11 = scmp.lt.s32.totalorder %s168_s25, %s168_s25 }
  0x21   :  { %p237_p10 = scmp.ne.s32.totalorder %s168_s25, %s236_s26  ;;  %p242_p12 = scmp.lt.s32.totalorder %s236_s26, %s236_s26 }
  0x22   :  { %53 = vadd.xlane.f32.xlu0 %v52_v8 }
  0x23   :  { %p243_p13 = por %p242_p12, %p241_p11 }
  0x25   :  { %p244_p0 = pnand %p243_p13, %p237_p10 }
  0x26   :  { %58 = vadd.xlane.f32.xlu0 %v57_v9 }
  0xab   :  { %v54_v15 = vpop.xlane.xlu0 %53 }
  0xac   :  { %v60_v17 = vmul.f32 0.00390625, %v54_v15 }
  0xae   :  { %v77_v20 = vrot.slane %v60_v17, %v76_v16 }
  0xaf   :  { %v59_v18 = vpop.xlane.xlu0 %58 }
  0xb0   :  { %v61_v19 = vmul.f32 0.00390625, %v59_v18 }
  0xb2   :  { %v81_v21 = vrot.slane %v61_v19, %v76_v16 }
  0xb4   :  { %v83_v22 = vsel %vm82_vm2, %v81_v21, %v77_v20 }
  0xb5   :  { %185 = vmatmul.mubr.msk.f32.vlgmr.msra.gmra.mxu0 %vm84_vm3, %v83_v22 }
 0x175   :  { %v156_v24 = vpop.f32.mrf.mxu0 }
 0x176   :  { %v157_v25 = vadd.f32 %v177_v23, %v156_v24 }
 0x177   :  { %v186_v26 = vpop.f32.mrf.mxu0 }
 0x178   :  { %160 = vst [vmem:[#allocation7] sm:$0x3] %v157_v25 }
 0x179   :  { %247 = shalt.err (!%p244_p0)
}
 0x17a   :  { %170 = dma.vmem_to_hbm [thread:$0]  %s168_s25, 32, %s309_s3, [#allocation4]  }
 0x17b   :  { %260 = dma.done.wait [#allocation4], 32  }
 0x17c   :  { %261 = vsyncadd [#allocation4], 4294967264 }
 0x17d   :  { %174 = vsyncpa [#allocation3], 1 }
 0x17e   :  { %175 = vsyncpa [#allocation6], 1 }
 0x17f   :  { %176 = vsyncpa [#allocation4], 1 }

</bundles_post_ra>
